<compile_context>
chip_gen: v6e
topology: v6e:2x2x1
jax: 0.10.0
libtpu: 0.0.40
codegen_flags: <defaults>
</compile_context>

<pallas_src>
import functools
import numpy as np

import jax
import jax.numpy as jnp
from jax.experimental import pallas as pl
from jax.experimental.pallas import tpu as pltpu

SB = 8            # sublane rows per block (second-to-last block dim)
MAX_LN = 8192     # max lanes (boxes) per block row -> up to SB*MAX_LN boxes/step
SMALL_N = 2048    # below this many boxes a plain fused XLA path beats a launch


def _ceil_div(a, b):
    return -(-a // b)


def _default_num_cores():
    """2 TensorCores only on v7x; v5e/v6e (and unknown chips) -> 1."""
    try:
        kind = jax.devices()[0].device_kind.lower()
    except Exception:
        return 1
    if "v7" in kind or "7x" in kind:
        return 2
    return 1


# ----------------------------------------------------------------------------
# Pallas kernel: dense per-box loss, masked + weighted, accumulated per core.
# p_ref / t_ref: (4, SB, LN) coordinate-planar f32; mw_ref: (SB, LN) mask(*w).
# acc_ref: (SB, LN) per-core resident accumulator (output block keyed on core).
# ----------------------------------------------------------------------------
def _boxes_loss_kernel(p_ref, t_ref, mw_ref, acc_ref, *, method):
    s = pl.program_id(1)                      # inner ("arbitrary") axis

    @pl.when(s == 0)                          # per-core accumulator init
    def _init():
        acc_ref[...] = jnp.zeros_like(acc_ref)

    mw = mw_ref[...]                          # (SB, LN)

    if method in ("smooth_l1", "mse"):
        d = p_ref[...] - t_ref[...]           # (4, SB, LN), fully sublane-dense
        if method == "mse":
            per_elem = d * d
        else:  # smooth_l1, beta = 1.0 (F.smooth_l1_loss default)
            ad = jnp.abs(d)
            per_elem = jnp.where(ad < 1.0, 0.5 * d * d, ad - 0.5)
        per_box = per_elem[0] + per_elem[1] + per_elem[2] + per_elem[3]
        acc_ref[...] = acc_ref[...] + per_box * mw
    else:
        # IoU family on d_ltrb (FCOS-style) boxes; all math on (SB, LN) tiles.
        pl_, pt_, pr_, pb_ = p_ref[0], p_ref[1], p_ref[2], p_ref[3]
        tl_, tt_, tr_, tb_ = t_ref[0], t_ref[1], t_ref[2], t_ref[3]

        inter = ((jnp.minimum(pl_, tl_) + jnp.minimum(pr_, tr_))
                 * (jnp.minimum(pt_, tt_) + jnp.minimum(pb_, tb_)))
        area_p = (pl_ + pr_) * (pt_ + pb_)
        area_t = (tl_ + tr_) * (tt_ + tb_)
        union = area_p + area_t - inter

        valid = mw != 0.0                     # padded / background boxes -> 0
        # Division -> reciprocal-multiply (EUP slot; keeps VALU free).
        iou = inter * pl.reciprocal(jnp.where(valid, union, 1.0), approx=False)

        if "giou" in method:
            enc = ((jnp.maximum(pl_, tl_) + jnp.maximum(pr_, tr_))
                   * (jnp.maximum(pt_, tt_) + jnp.maximum(pb_, tb_)))
            inv_enc = pl.reciprocal(jnp.where(valid, enc, 1.0), approx=False)
            # iou - (enc - union)/enc == iou - 1 + union/enc
            metric = iou - 1.0 + union * inv_enc
        else:
            metric = iou

        if method.startswith("log"):
            safe = jnp.where(valid, jnp.maximum(metric, 1e-8), 1.0)
            per_box = -jnp.log(safe)
        else:
            per_box = 1.0 - metric

        acc_ref[...] = acc_ref[...] + per_box * mw


def _pick_tiling(n_boxes, ncores, max_ln):
    """Lane width LN (multiple of 128) and inner step count per core."""
    per_core = _ceil_div(max(n_boxes, 1), ncores)
    steps = max(1, _ceil_div(per_core, SB * max_ln))
    per_step = _ceil_div(per_core, steps)
    ln = min(max_ln, max(128, _ceil_div(per_step, SB * 128) * 128))
    return ln, steps


def _run_kernel(p4, t4, mw2, method, ncores, steps, ln):
    kernel = functools.partial(_boxes_loss_kernel, method=method)
    if ncores > 1:
        # Guarantee the leading axis shards across v7x's two TensorCores.
        lead_sem = getattr(pltpu, "CORE_PARALLEL", "parallel")
    else:
        lead_sem = "arbitrary"
    out = pl.pallas_call(
        kernel,
        out_shape=jax.ShapeDtypeStruct((ncores * SB, ln), jnp.float32),
        grid=(ncores, steps),
        in_specs=[
            # TODO(synk): if v5e xprof still shows exposed input DMA at these
            # tile sizes, add pipeline_mode=pl.Buffered(3) to the box specs.
            pl.BlockSpec((4, SB, ln), lambda c, s: (0, c * steps + s, 0)),
            pl.BlockSpec((4, SB, ln), lambda c, s: (0, c * steps + s, 0)),
            pl.BlockSpec((SB, ln), lambda c, s: (c * steps + s, 0)),
        ],
        out_specs=pl.BlockSpec((SB, ln), lambda c, s: (c, 0)),
        compiler_params=pltpu.CompilerParams(
            dimension_semantics=(lead_sem, "arbitrary")),
    )(p4, t4, mw2)
    # tiny (ncores*SB, LN) final reduction as glue in plain JAX
    return jnp.sum(out)


def _dense_loss_sum(p, t, mw, method):
    """Plain-jnp loss sum on (N,4)/(N,) arrays — small-N fast path."""
    if method in ("smooth_l1", "mse"):
        d = p - t
        if method == "mse":
            per_elem = d * d
        else:
            ad = jnp.abs(d)
            per_elem = jnp.where(ad < 1.0, 0.5 * d * d, ad - 0.5)
        return jnp.sum(jnp.sum(per_elem, axis=-1) * mw)
    pl_, pt_, pr_, pb_ = p[:, 0], p[:, 1], p[:, 2], p[:, 3]
    tl_, tt_, tr_, tb_ = t[:, 0], t[:, 1], t[:, 2], t[:, 3]
    inter = ((jnp.minimum(pl_, tl_) + jnp.minimum(pr_, tr_))
             * (jnp.minimum(pt_, tt_) + jnp.minimum(pb_, tb_)))
    union = (pl_ + pr_) * (pt_ + pb_) + (tl_ + tr_) * (tt_ + tb_) - inter
    valid = mw != 0.0
    iou = inter / jnp.where(valid, union, 1.0)
    if "giou" in method:
        enc = ((jnp.maximum(pl_, tl_) + jnp.maximum(pr_, tr_))
               * (jnp.maximum(pt_, tt_) + jnp.maximum(pb_, tb_)))
        metric = iou - (enc - union) / jnp.where(valid, enc, 1.0)
    else:
        metric = iou
    if method.startswith("log"):
        per_box = -jnp.log(jnp.where(valid, jnp.maximum(metric, 1e-8), 1.0))
    else:
        per_box = 1.0 - metric
    return jnp.sum(per_box * mw)


# ----------------------------------------------------------------------------
# Jitted forward: layout glue + kernel + reduction (fused by XLA).
# ----------------------------------------------------------------------------
@functools.partial(jax.jit,
                   static_argnames=("method", "reduction", "ncores", "max_ln",
                                    "use_kernel"))
def _boxes_loss_fwd(p_boxes, t_boxes, t_label, weights, *, method, reduction,
                    ncores, max_ln, use_kernel):
    p = jnp.reshape(p_boxes, (-1, 4)).astype(jnp.float32)
    t = jnp.reshape(t_boxes, (-1, 4)).astype(jnp.float32)
    lbl = jnp.reshape(t_label, (-1,))
    mask = (lbl > 0).astype(jnp.float32)

    # One combined mask*weight stream (weights only apply to the IoU family,
    # matching the PyTorch module which never passes weights to smooth_l1/mse).
    if weights is not None and method not in ("smooth_l1", "mse"):
        mw = mask * jnp.reshape(weights, (-1,)).astype(jnp.float32)
    else:
        mw = mask

    n = p.shape[0]
    if use_kernel:
        ln, steps = _pick_tiling(n, ncores, max_ln)
        rows = ncores * steps * SB
        n_pad = rows * ln
        pad = n_pad - n
        # Coordinate-planar (4, rows, ln) layout; cast + pad + transpose +
        # reshape fuse into one XLA copy per input (no concat pass).
        p4 = jnp.transpose(jnp.pad(p, ((0, pad), (0, 0)))).reshape(4, rows, ln)
        t4 = jnp.transpose(jnp.pad(t, ((0, pad), (0, 0)))).reshape(4, rows, ln)
        mw2 = jnp.pad(mw, (0, pad)).reshape(rows, ln)
        loss_sum = _run_kernel(p4, t4, mw2, method, ncores, steps, ln)
    else:
        loss_sum = _dense_loss_sum(p, t, mw, method)

    count = jnp.sum(mask)                                # number of valid boxes
    if reduction == "sum":
        return loss_sum
    if method in ("smooth_l1", "mse"):
        denom = count * 4.0 if reduction == "mean" else count
    else:                                                # IoU family: mean over boxes
        denom = count
    # NOTE: like the PyTorch reference, count == 0 yields NaN for 'mean'.
    return loss_sum / denom


# ----------------------------------------------------------------------------
# BoxesLoss wrapper mirroring the PyTorch module's forward() semantics.
# ----------------------------------------------------------------------------
class BoxesLossPallas:
    METHODS = ('smooth_l1', 'mse', 'iou', 'log_iou', 'giou', 'log_giou')

    def __init__(self, method='log_iou', l1_alpha=0.5, l1_gamma=1.5,
                 reduction='mean', max_lane_tile=MAX_LN,
                 small_n_threshold=SMALL_N, num_cores=None):
        method = method.lower()
        if method not in self.METHODS:
            # TODO(synk): 'balanced_l1' uses tensormonk's external BalancedL1Loss
            # (source not provided) and is not implemented here.
            raise ValueError('BoxesLossPallas: unsupported method {}'.format(method))
        if reduction is None:
            # TODO(synk): reduction=None returns a data-dependent-shaped tensor
            # (boolean-selected boxes); not expressible as a static Pallas output.
            raise ValueError('BoxesLossPallas: reduction=None not supported')
        reduction = reduction.lower()
        if reduction not in ('sum', 'mean', 'mean_of_sum'):
            raise ValueError('BoxesLossPallas: bad reduction {}'.format(reduction))
        if reduction == 'mean_of_sum' and method not in ('smooth_l1', 'mse'):
            reduction = 'mean'   # matches the PyTorch module's warning path
        self._method = method
        self._reduction = reduction
        self._l1_alpha, self._l1_gamma = l1_alpha, l1_gamma   # unused (beta=1.0)
        self._max_ln = max(128, (int(max_lane_tile) // 128) * 128)
        self._small_n = int(small_n_threshold)
        self._ncores = _default_num_cores() if num_cores is None else int(num_cores)
        self.tensor_size = (1,)

    def __call__(self, p_boxes, t_boxes, t_label, weights=None):
        assert p_boxes.shape == t_boxes.shape, \
            'BoxesLoss: p_boxes.shape != t_boxes.shape'
        assert p_boxes.shape[-1] == 4 and t_boxes.shape[-1] == 4, \
            'BoxesLoss: p_boxes.shape[-1]/t_boxes.shape[-1] != 4'
        assert p_boxes.shape[:-1] == t_label.shape, \
            'BoxesLoss: p_boxes.shape[:-1] != t_label.shape'
        if weights is not None:
            assert weights.shape == t_label.shape, \
                'BoxesLoss: weights.shape != t_label.shape'
        n = 1
        for d in t_label.shape:
            n *= int(d)
        use_kernel = n > self._small_n
        return _boxes_loss_fwd(p_boxes, t_boxes, t_label, weights,
                               method=self._method, reduction=self._reduction,
                               ncores=self._ncores, max_ln=self._max_ln,
                               use_kernel=use_kernel)


# ----------------------------------------------------------------------------
# Pure-numpy reference (mirrors the PyTorch semantics with boolean selection).
# ----------------------------------------------------------------------------
def _ref_loss(p, t, lbl, w, method, reduction):
    p = np.asarray(p, np.float32).reshape(-1, 4)
    t = np.asarray(t, np.float32).reshape(-1, 4)
    valid = np.asarray(lbl).reshape(-1) > 0
    p, t = p[valid], t[valid]
    if w is not None:
        w = np.asarray(w, np.float32).reshape(-1)[valid]
    if method in ('smooth_l1', 'mse'):
        d = p - t
        if method == 'mse':
            loss = d * d
        else:
            ad = np.abs(d)
            loss = np.where(ad < 1.0, 0.5 * d * d, ad - 0.5)
        if reduction == 'sum':
            return loss.sum()
        if reduction == 'mean_of_sum':
            return loss.sum(-1).mean()
        return loss.mean()
    pl_, pt_, pr_, pb_ = p[:, 0], p[:, 1], p[:, 2], p[:, 3]
    tl_, tt_, tr_, tb_ = t[:, 0], t[:, 1], t[:, 2], t[:, 3]
    inter = ((np.minimum(pl_, tl_) + np.minimum(pr_, tr_))
             * (np.minimum(pt_, tt_) + np.minimum(pb_, tb_)))
    union = (pl_ + pr_) * (pt_ + pb_) + (tl_ + tr_) * (tt_ + tb_) - inter
    iou = inter / union
    if 'giou' in method:
        enc = ((np.maximum(pl_, tl_) + np.maximum(pr_, tr_))
               * (np.maximum(pt_, tt_) + np.maximum(pb_, tb_)))
        metric = iou - (enc - union) / enc
    else:
        metric = iou
    loss = -np.log(np.maximum(metric, 1e-8)) if method.startswith('log') else 1.0 - metric
    if w is not None:
        loss = loss * w
    return loss.sum() if reduction == 'sum' else loss.mean()


if __name__ == "__main__":
    key = jax.random.PRNGKey(0)
    k1, k2, k3, k4, k5, k6, k7, k8 = jax.random.split(key, 8)

    # --- Small workload, forced through the Pallas kernel (threshold=0) ------
    B, A = 2, 96                                # 192 boxes
    p_boxes = jax.random.uniform(k1, (B, A, 4), jnp.float32, 0.1, 2.0)
    t_boxes = jax.random.uniform(k2, (B, A, 4), jnp.float32, 0.1, 2.0)
    t_label = jax.random.randint(k3, (B, A), 0, 3)          # 0 = background
    weights = jax.random.uniform(k4, (B, A), jnp.float32, 0.5, 1.5)

    configs = [
        ('log_iou', 'mean', weights),   # module defaults
        ('iou', 'sum', None),
        ('giou', 'mean', None),
        ('log_giou', 'mean', weights),
        ('smooth_l1', 'mean', None),
        ('smooth_l1', 'mean_of_sum', None),
        ('mse', 'sum', None),
    ]
    for method, reduction, wts in configs:
        loss_fn = BoxesLossPallas(method=method, reduction=reduction,
                                  small_n_threshold=0)     # force kernel path
        out = jax.block_until_ready(loss_fn(p_boxes, t_boxes, t_label, wts))
        ref = _ref_loss(np.asarray(p_boxes), np.asarray(t_boxes),
                        np.asarray(t_label),
                        None if wts is None else np.asarray(wts),
                        method, reduction)
        assert np.allclose(np.asarray(out), ref, rtol=1e-4, atol=1e-4), \
            ('kernel', method, reduction, float(out), float(ref))

    # --- Same small workload through the small-N XLA fast path (default) -----
    for method, reduction, wts in [('log_iou', 'mean', weights),
                                   ('smooth_l1', 'mean', None)]:
        loss_fn = BoxesLossPallas(method=method, reduction=reduction)
        out = jax.block_until_ready(loss_fn(p_boxes, t_boxes, t_label, wts))
        ref = _ref_loss(np.asarray(p_boxes), np.asarray(t_boxes),
                        np.asarray(t_label),
                        None if wts is None else np.asarray(wts),
                        method, reduction)
        assert np.allclose(np.asarray(out), ref, rtol=1e-4, atol=1e-4), \
            ('fastpath', method, reduction, float(out), float(ref))

    # --- Multi-step path: 2400 boxes with a forced 128-lane tile --------------
    # (exercises the per-core resident accumulator across several grid steps)
    B2, A2 = 2, 1200
    p2 = jax.random.uniform(k5, (B2, A2, 4), jnp.float32, 0.1, 2.0)
    t2 = jax.random.uniform(k6, (B2, A2, 4), jnp.float32, 0.1, 2.0)
    l2 = jax.random.randint(k7, (B2, A2), 0, 3)
    w2 = jax.random.uniform(k8, (B2, A2), jnp.float32, 0.5, 1.5)
    for method, reduction, wts in [('log_iou', 'mean', w2),
                                   ('smooth_l1', 'mean', None)]:
        loss_fn = BoxesLossPallas(method=method, reduction=reduction,
                                  max_lane_tile=128, small_n_threshold=0)
        out = jax.block_until_ready(loss_fn(p2, t2, l2, wts))
        ref = _ref_loss(np.asarray(p2), np.asarray(t2), np.asarray(l2),
                        None if wts is None else np.asarray(wts),
                        method, reduction)
        assert np.allclose(np.asarray(out), ref, rtol=1e-4, atol=1e-4), \
            ('multistep', method, reduction, float(out), float(ref))

    print("KERNEL_OK")
</pallas_src>

<mosaic_0001>
module attributes {stable_mosaic.version = 11 : i64} {
  func.func @_boxes_loss_kernel(%arg0: i32, %arg1: i32, %arg2: memref<4x8x128xf32, #tpu.memory_space<vmem>>, %arg3: memref<4x8x128xf32, #tpu.memory_space<vmem>>, %arg4: memref<8x128xf32, #tpu.memory_space<vmem>>, %arg5: memref<8x128xf32, #tpu.memory_space<vmem>>) attributes {dimension_semantics = [#tpu.dimension_semantics<arbitrary>, #tpu.dimension_semantics<arbitrary>], iteration_bounds = array<i64: 1, 1>, scalar_prefetch = 0 : i64, scratch_operands = 0 : i64, tpu.core_type = #tpu.core_type<tc>, window_params = [{transform_indices = @transform_0, window_bounds = array<i64: 4, 8, 128>}, {transform_indices = @transform_1, window_bounds = array<i64: 4, 8, 128>}, {transform_indices = @transform_2, window_bounds = array<i64: 8, 128>}, {transform_indices = @transform_3, window_bounds = array<i64: 8, 128>}]} {
    %c0_i32 = arith.constant 0 : i32
    %0 = arith.cmpi eq, %arg1, %c0_i32 : i32
    %1 = arith.extui %0 : i1 to i32
    %c0_i32_0 = arith.constant 0 : i32
    %2 = arith.cmpi ne, %1, %c0_i32_0 : i32
    scf.if %2 {
      %cst_31 = arith.constant 0.000000e+00 : f32
      %52 = vector.broadcast %cst_31 : f32 to vector<8x128xf32>
      %c0_32 = arith.constant 0 : index
      %c0_33 = arith.constant 0 : index
      %53 = vector.load %arg5[%c0_32, %c0_33] : memref<8x128xf32, #tpu.memory_space<vmem>>, vector<8x128xf32>
      tpu.vector_store %arg5[%c0_32, %c0_33], %52 {strides = array<i32>} : memref<8x128xf32, #tpu.memory_space<vmem>>, vector<8x128xf32>,
    } else {
    }
    %c0 = arith.constant 0 : index
    %c0_1 = arith.constant 0 : index
    %3 = vector.load %arg4[%c0, %c0_1] : memref<8x128xf32, #tpu.memory_space<vmem>>, vector<8x128xf32>
    %c0_2 = arith.constant 0 : index
    %c0_3 = arith.constant 0 : index
    %c0_4 = arith.constant 0 : index
    %4 = vector.load %arg2[%c0_2, %c0_3, %c0_4] : memref<4x8x128xf32, #tpu.memory_space<vmem>>, vector<1x8x128xf32>
    %5 = vector.shape_cast %4 : vector<1x8x128xf32> to vector<8x128xf32>
    %c1 = arith.constant 1 : index
    %c0_5 = arith.constant 0 : index
    %c0_6 = arith.constant 0 : index
    %6 = vector.load %arg2[%c1, %c0_5, %c0_6] : memref<4x8x128xf32, #tpu.memory_space<vmem>>, vector<1x8x128xf32>
    %7 = vector.shape_cast %6 : vector<1x8x128xf32> to vector<8x128xf32>
    %c2 = arith.constant 2 : index
    %c0_7 = arith.constant 0 : index
    %c0_8 = arith.constant 0 : index
    %8 = vector.load %arg2[%c2, %c0_7, %c0_8] : memref<4x8x128xf32, #tpu.memory_space<vmem>>, vector<1x8x128xf32>
    %9 = vector.shape_cast %8 : vector<1x8x128xf32> to vector<8x128xf32>
    %c3 = arith.constant 3 : index
    %c0_9 = arith.constant 0 : index
    %c0_10 = arith.constant 0 : index
    %10 = vector.load %arg2[%c3, %c0_9, %c0_10] : memref<4x8x128xf32, #tpu.memory_space<vmem>>, vector<1x8x128xf32>
    %11 = vector.shape_cast %10 : vector<1x8x128xf32> to vector<8x128xf32>
    %c0_11 = arith.constant 0 : index
    %c0_12 = arith.constant 0 : index
    %c0_13 = arith.constant 0 : index
    %12 = vector.load %arg3[%c0_11, %c0_12, %c0_13] : memref<4x8x128xf32, #tpu.memory_space<vmem>>, vector<1x8x128xf32>
    %13 = vector.shape_cast %12 : vector<1x8x128xf32> to vector<8x128xf32>
    %c1_14 = arith.constant 1 : index
    %c0_15 = arith.constant 0 : index
    %c0_16 = arith.constant 0 : index
    %14 = vector.load %arg3[%c1_14, %c0_15, %c0_16] : memref<4x8x128xf32, #tpu.memory_space<vmem>>, vector<1x8x128xf32>
    %15 = vector.shape_cast %14 : vector<1x8x128xf32> to vector<8x128xf32>
    %c2_17 = arith.constant 2 : index
    %c0_18 = arith.constant 0 : index
    %c0_19 = arith.constant 0 : index
    %16 = vector.load %arg3[%c2_17, %c0_18, %c0_19] : memref<4x8x128xf32, #tpu.memory_space<vmem>>, vector<1x8x128xf32>
    %17 = vector.shape_cast %16 : vector<1x8x128xf32> to vector<8x128xf32>
    %c3_20 = arith.constant 3 : index
    %c0_21 = arith.constant 0 : index
    %c0_22 = arith.constant 0 : index
    %18 = vector.load %arg3[%c3_20, %c0_21, %c0_22] : memref<4x8x128xf32, #tpu.memory_space<vmem>>, vector<1x8x128xf32>
    %19 = vector.shape_cast %18 : vector<1x8x128xf32> to vector<8x128xf32>
    %20 = arith.minimumf %5, %13 : vector<8x128xf32>
    %21 = arith.minimumf %9, %17 : vector<8x128xf32>
    %22 = arith.addf %20, %21 : vector<8x128xf32>
    %23 = arith.minimumf %7, %15 : vector<8x128xf32>
    %24 = arith.minimumf %11, %19 : vector<8x128xf32>
    %25 = arith.addf %23, %24 : vector<8x128xf32>
    %26 = arith.mulf %22, %25 : vector<8x128xf32>
    %27 = arith.addf %5, %9 : vector<8x128xf32>
    %28 = arith.addf %7, %11 : vector<8x128xf32>
    %29 = arith.mulf %27, %28 : vector<8x128xf32>
    %30 = arith.addf %13, %17 : vector<8x128xf32>
    %31 = arith.addf %15, %19 : vector<8x128xf32>
    %32 = arith.mulf %30, %31 : vector<8x128xf32>
    %33 = arith.addf %29, %32 : vector<8x128xf32>
    %34 = arith.subf %33, %26 : vector<8x128xf32>
    %cst = arith.constant 0.000000e+00 : f32
    %35 = vector.broadcast %cst : f32 to vector<8x128xf32>
    %36 = arith.cmpf one, %3, %35 : vector<8x128xf32>
    %cst_23 = arith.constant 1.000000e+00 : f32
    %37 = vector.broadcast %cst_23 : f32 to vector<8x128xf32>
    %38 = arith.select %36, %34, %37 : vector<8x128xi1>, vector<8x128xf32>
    %39 = tpu.reciprocal %38 : vector<8x128xf32> -> vector<8x128xf32>
    %40 = arith.mulf %26, %39 : vector<8x128xf32>
    %cst_24 = arith.constant 9.99999993E-9 : f32
    %41 = vector.broadcast %cst_24 : f32 to vector<8x128xf32>
    %42 = arith.maximumf %40, %41 : vector<8x128xf32>
    %cst_25 = arith.constant 1.000000e+00 : f32
    %43 = vector.broadcast %cst_25 : f32 to vector<8x128xf32>
    %44 = arith.select %36, %42, %43 : vector<8x128xi1>, vector<8x128xf32>
    %45 = math.log %44 : vector<8x128xf32>
    %cst_26 = arith.constant 0.000000e+00 : f32
    %46 = vector.broadcast %cst_26 : f32 to vector<8x128xf32>
    %47 = arith.subf %46, %45 : vector<8x128xf32>
    %c0_27 = arith.constant 0 : index
    %c0_28 = arith.constant 0 : index
    %48 = vector.load %arg5[%c0_27, %c0_28] : memref<8x128xf32, #tpu.memory_space<vmem>>, vector<8x128xf32>
    %49 = arith.mulf %47, %3 : vector<8x128xf32>
    %50 = arith.addf %48, %49 : vector<8x128xf32>
    %c0_29 = arith.constant 0 : index
    %c0_30 = arith.constant 0 : index
    %51 = vector.load %arg5[%c0_29, %c0_30] : memref<8x128xf32, #tpu.memory_space<vmem>>, vector<8x128xf32>
    tpu.vector_store %arg5[%c0_29, %c0_30], %50 {strides = array<i32>} : memref<8x128xf32, #tpu.memory_space<vmem>>, vector<8x128xf32>,
    return
  }
  func.func @transform_0(%arg0: i32, %arg1: i32) -> (i32, i32, i32) {
    %c1_i32 = arith.constant 1 : i32
    %0 = arith.muli %arg0, %c1_i32 : i32
    %1 = arith.addi %0, %arg1 : i32
    %c0_i32 = arith.constant 0 : i32
    %c0_i32_0 = arith.constant 0 : i32
    %c0_i32_1 = arith.constant 0 : i32
    return %c0_i32, %1, %c0_i32_0 : i32, i32, i32
  }
  func.func @transform_1(%arg0: i32, %arg1: i32) -> (i32, i32, i32) {
    %c1_i32 = arith.constant 1 : i32
    %0 = arith.muli %arg0, %c1_i32 : i32
    %1 = arith.addi %0, %arg1 : i32
    %c0_i32 = arith.constant 0 : i32
    %c0_i32_0 = arith.constant 0 : i32
    %c0_i32_1 = arith.constant 0 : i32
    return %c0_i32, %1, %c0_i32_0 : i32, i32, i32
  }
  func.func @transform_2(%arg0: i32, %arg1: i32) -> (i32, i32) {
    %c1_i32 = arith.constant 1 : i32
    %0 = arith.muli %arg0, %c1_i32 : i32
    %1 = arith.addi %0, %arg1 : i32
    %c0_i32 = arith.constant 0 : i32
    %c0_i32_0 = arith.constant 0 : i32
    return %1, %c0_i32 : i32, i32
  }
  func.func @transform_3(%arg0: i32, %arg1: i32) -> (i32, i32) {
    %c0_i32 = arith.constant 0 : i32
    %c0_i32_0 = arith.constant 0 : i32
    return %arg0, %c0_i32 : i32, i32
  }
}

</mosaic_0001>

<bundles_post_ra>
// kernel: _boxes_loss_fwd.1
= control target key start
LH: loop header
LB: loop body
LE: loop exit
PB: predicated region body
PF: predicated region fallthrough
CT: control target
= control target key end

     0   :  { %s196_s0 = inlined_call_operand.vmem [shape: f32[4,8,128], index: 0, kind: input, shape index: {}]   ;;  %s197_s1 = inlined_call_operand.vmem [shape: f32[4,8,128], index: 1, kind: input, shape index: {}]   ;;  %s198_s2 = inlined_call_operand.vmem [shape: f32[8,128], index: 2, kind: input, shape index: {}]   ;;  %s199_s3 = inlined_call_operand.vmem [shape: f32[8,128], index: 3, kind: output, shape index: {}]  }
   0x1   :  { %v71_v0 = vld [vmem:[%s196_s0] sm:$0xff]  ;;  %v135_v1 = vld [vmem:[%s196_s0 + $0x8] sm:$0xff]  ;;  %v136_v2 = vld [vmem:[%s196_s0 + $0x10] sm:$0xff] }
   0x2   :  { %v137_v3 = vld [vmem:[%s196_s0 + $0x18] sm:$0xff]  ;;  %v78_v4 = vld [vmem:[%s197_s1] sm:$0xff]  ;;  %v138_v5 = vld [vmem:[%s197_s1 + $0x8] sm:$0xff]  ;;  %v92_v9 = vadd.f32 %v136_v2, %v71_v0 }
   0x3   :  { %v139_v6 = vld [vmem:[%s197_s1 + $0x10] sm:$0xff]  ;;  %v140_v7 = vld [vmem:[%s197_s1 + $0x18] sm:$0xff]  ;;  %v85_v8 = vmin.f32 %v71_v0, %v78_v4  ;;  %v93_v10 = vadd.f32 %v137_v3, %v135_v1  ;;  %v88_v12 = vmin.f32 %v135_v1, %v138_v5  ;;  %v70_v19 = vld [vmem:[%s198_s2] sm:$0xff] }
   0x4   :  { %v86_v11 = vmin.f32 %v136_v2, %v139_v6  ;;  %v89_v13 = vmin.f32 %v137_v3, %v140_v7  ;;  %v95_v14 = vadd.f32 %v139_v6, %v78_v4  ;;  %v96_v16 = vadd.f32 %v140_v7, %v138_v5 }
   0x5   :  { %v94_v15 = vmul.f32 %v93_v10, %v92_v9  ;;  %vm100_vm0 = vcmp.ne.f32.partialorder %v70_v19, 0.0 }
   0x6   :  { %v87_v17 = vadd.f32 %v86_v11, %v85_v8  ;;  %v90_v18 = vadd.f32 %v89_v13, %v88_v12  ;;  %v97_v20 = vmul.f32 %v96_v16, %v95_v14 }
   0x8   :  { %v91_v21 = vmul.f32 %v90_v18, %v87_v17  ;;  %v98_v22 = vadd.f32 %v97_v20, %v94_v15 }
   0xa   :  { %v99_v23 = vsub.f32 %v98_v22, %v91_v21 }
   0xc   :  { %v101_v24 = vsel %vm100_vm0, %v99_v23, 1.0 }
   0xd   :  { %142 = vrcp.f32 %v101_v24 }
  0x1a   :  { %v143_v25 = vpop.eup %142 }
  0x1b   :  { %v103_v26 = vmul.f32 %v143_v25, %v91_v21 }
  0x1d   :  { %v104_v27 = vmax.f32 %v103_v26, 1e-08 }
  0x1f   :  { %v105_v28 = vsel %vm100_vm0, %v104_v27, 1.0 }
  0x20   :  { %144 = vlog2.f32 %v105_v28 }
  0x2d   :  { %v145_v29 = vpop.eup %144 }
  0x2e   :  { %v107_v30 = vmul.f32 0.6931472, %v145_v29 }
  0x30   :  { %v108_v31 = vsub.f32 0.0, %v107_v30 }
  0x32   :  { %v110_v32 = vmul.f32 %v108_v31, %v70_v19 }
  0x34   :  { %112 = vst [vmem:[%s199_s3] sm:$0xff] %v110_v32 }

</bundles_post_ra>
